<compile_context>
chip_gen: v7x
topology: tpu7x:2x2x1
jax: 0.10.0
libtpu: 0.0.40
codegen_flags: <defaults>
</compile_context>

<pallas_src>
import functools

import jax
import jax.numpy as jnp
from jax.experimental import pallas as pl
from jax.experimental.pallas import tpu as pltpu


# ---------------------------------------------------------------------------
# Helpers
# ---------------------------------------------------------------------------
def _cdiv(a, b):
    return (a + b - 1) // b


def _round_up(x, m):
    return _cdiv(x, m) * m


def _sublane(dtype):
    # 8 sublanes of 32-bit; sub-32-bit dtypes pack along sublanes.
    return max(8, 32 // jnp.dtype(dtype).itemsize)


def _tpu_defaults():
    """Per-TPU-generation (target_tile_m, target_tile_h, vmem_limit_bytes)."""
    kind = ""
    try:
        kind = jax.devices()[0].device_kind.lower()
    except Exception:
        pass
    if "v7" in kind:
        # 64 MiB VMEM per TensorCore, ridge ~310 FLOPs/byte: modest tiles and
        # headroom for Mosaic internal scratch + f32 gate temporaries.
        return 512, 256, 54 << 20
    if "v6" in kind:
        # 128 MiB VMEM, ridge ~680 FLOPs/byte: large m tiles so weight
        # streaming amortizes and the kernel is MXU-bound, not DMA-bound.
        return 1024, 512, 100 << 20
    if "v5" in kind:
        # 128 MiB VMEM, ridge ~240 FLOPs/byte.
        return 512, 512, 96 << 20
    # Unknown / older generation: conservative values that fit a 64 MiB budget.
    return 512, 256, 54 << 20


def _clamp_vmem_limit(vmem_limit_bytes):
    """Never request more than ~85% of the chip's physical VMEM."""
    try:
        cap = pltpu.get_tpu_info().vmem_capacity_bytes
        return min(vmem_limit_bytes, int(cap * 0.85))
    except Exception:
        return vmem_limit_bytes


def _pick_tile_h(H, target):
    """Largest 128-aligned divisor of H that is <= target, or H itself when
    H <= target (full-extent block)."""
    if H <= target:
        return H
    t = (min(target, H) // 128) * 128
    while t >= 128:
        if H % t == 0:
            return t
        t -= 128
    return H  # no lane-aligned divisor <= target -> untiled hidden dim


def _pick_tile_m(M, target, sub):
    """Adaptive m tile: round_up(cdiv(M, cdiv(M, target)), sublane) so padding
    waste stays bounded even when the roofline-driven target is large."""
    target = max(sub, _round_up(target, sub))
    n_tiles = max(1, _cdiv(M, target))
    return _round_up(_cdiv(max(M, 1), n_tiles), sub)


# ---------------------------------------------------------------------------
# Kernel
# ---------------------------------------------------------------------------
def ffn_kernel(x_ref, w12_ref, w3_ref, o_ref, acc_ref, *, tile_h):
    # x_ref:   (tile_m, E)
    # w12_ref: (E, 2*tile_h)  fused, pre-transposed fc1|fc2 weight tile
    # w3_ref:  (tile_h, E)    pre-transposed fc3 weight tile
    # o_ref:   (tile_m, E)
    # acc_ref: (tile_m, E) f32 accumulator over the hidden-dim grid axis
    h = pl.program_id(1)

    @pl.when(h == 0)
    def _():
        acc_ref[...] = jnp.zeros_like(acc_ref)

    x = x_ref[...]
    # Single fused up-projection for fc1 and fc2 (one MXU pass, N = 2*tile_h).
    h12 = jnp.dot(x, w12_ref[...], preferred_element_type=jnp.float32)
    h1 = h12[:, :tile_h]
    h2 = h12[:, tile_h:]
    # SiLU gate in f32 (sigmoid -> EUP slot; muls -> VPU). A bf16 gate is an
    # option on v6e/v7x, but only pays off if VPU/VMEM-bound (MXU/DMA expected
    # to dominate), so keep the accurate f32 path.
    g = h1 * jax.nn.sigmoid(h1)
    g = g * h2
    # Down projection, accumulated across hidden tiles.
    acc_ref[...] += jnp.dot(g.astype(w3_ref.dtype), w3_ref[...],
                            preferred_element_type=jnp.float32)

    @pl.when(h == pl.num_programs(1) - 1)
    def _():
        o_ref[...] = acc_ref[...].astype(o_ref.dtype)


# ---------------------------------------------------------------------------
# One-time weight packing (model-init analog — NOT a per-call cost)
# ---------------------------------------------------------------------------
def pack_ffn_weights(w1, w2, w3, tile_h):
    """Pack torch-layout weights for the kernel.

    w1, w2: (H, E) = nn.Linear(E->H).weight ; w3: (E, H) = nn.Linear(H->E).weight
    Returns:
      w12:  (E, 2*H), per-hidden-tile interleaved: within tile h the first
            tile_h columns are fc1's tile-h columns, the next tile_h are fc2's.
      w3_t: (H, E)
    """
    H, E = w1.shape
    assert H % tile_h == 0
    n_h = H // tile_h
    w1_t = w1.T.reshape(E, n_h, tile_h)
    w2_t = w2.T.reshape(E, n_h, tile_h)
    w12 = jnp.stack([w1_t, w2_t], axis=2).reshape(E, 2 * H)
    return w12, w3.T


# ---------------------------------------------------------------------------
# Forward pass (packed weights — preferred entry point)
# ---------------------------------------------------------------------------
def feed_forward_packed(x, w12, w3_t, *, tile_h, tile_m=None,
                        vmem_limit_bytes=None, x_buffers=None,
                        weight_buffers=None):
    """x: (B, S, E); (w12, w3_t) from pack_ffn_weights(..., tile_h)."""
    B, S, E = x.shape
    H, E2 = w3_t.shape
    assert E2 == E and w12.shape == (E, 2 * H)
    assert H % tile_h == 0, "hidden_dim must be divisible by tile_h"
    # When the hidden dim is tiled, tile_h must be 128-aligned so the
    # h12[:, :tile_h] / [:, tile_h:] slices stay lane-aligned (no per-step XLU
    # relayout) and the (E, 2*tile_h) block satisfies the (8,128) constraint.
    assert tile_h == H or tile_h % 128 == 0, "tile_h must be 128-aligned when < H"

    target_m, _, default_vmem = _tpu_defaults()
    if vmem_limit_bytes is None:
        vmem_limit_bytes = default_vmem
    vmem_limit_bytes = _clamp_vmem_limit(vmem_limit_bytes)

    M = B * S
    sub = _sublane(x.dtype)
    if tile_m is None:
        tile_m = _pick_tile_m(M, target_m, sub)
    else:
        tile_m = _round_up(min(tile_m, _round_up(M, sub)), sub)
    assert tile_m % sub == 0

    m_pad = _round_up(M, tile_m)
    x2d = x.reshape(M, E)
    if m_pad != M:
        x2d = jnp.pad(x2d, ((0, m_pad - M), (0, 0)))

    grid = (m_pad // tile_m, H // tile_h)

    def _spec(shape, index_map, buffers):
        if buffers is None:
            return pl.BlockSpec(shape, index_map)
        return pl.BlockSpec(shape, index_map, pipeline_mode=pl.Buffered(buffers))

    # Advisory cost: weights are re-streamed once per m tile, not once total.
    n_m = grid[0]
    w_bytes = w12.size * w12.dtype.itemsize + w3_t.size * w3_t.dtype.itemsize
    bytes_accessed = (x2d.size * x2d.dtype.itemsize
                      + n_m * w_bytes
                      + m_pad * E * x.dtype.itemsize)
    cost = pl.CostEstimate(flops=6 * m_pad * E * H,
                           transcendentals=m_pad * H,
                           bytes_accessed=bytes_accessed)

    kernel = functools.partial(ffn_kernel, tile_h=tile_h)

    # TODO(synk): for decode-sized M on v7x (single m tile) one TensorCore
    # idles; shard the hidden axis across cores (two partial fc3 sums + add).
    out2d = pl.pallas_call(
        kernel,
        out_shape=jax.ShapeDtypeStruct((m_pad, E), x.dtype),
        grid_spec=pltpu.PrefetchScalarGridSpec(
            num_scalar_prefetch=0,
            grid=grid,
            in_specs=[
                # x block index is constant over the inner h axis; on a tight
                # VMEM budget (v7x) pass x_buffers=1 to drop its second buffer.
                _spec((tile_m, E), lambda m, h: (m, 0), x_buffers),
                # weight_buffers=3 hides weight-DMA burstiness when HBM-bound
                # (small tile_m / decode); sweep 2 vs 3, drop if VMEM-tight.
                _spec((E, 2 * tile_h), lambda m, h: (0, h), weight_buffers),
                _spec((tile_h, E), lambda m, h: (h, 0), weight_buffers),
            ],
            out_specs=pl.BlockSpec((tile_m, E), lambda m, h: (m, 0)),
            scratch_shapes=[pltpu.VMEM((tile_m, E), jnp.float32)],
        ),
        compiler_params=pltpu.CompilerParams(
            dimension_semantics=("parallel", "arbitrary"),
            vmem_limit_bytes=vmem_limit_bytes,
        ),
        cost_estimate=cost,
    )(x2d, w12, w3_t)

    return out2d[:M].reshape(B, S, E)


def feed_forward(x, w1, w2, w3, *, tile_h=None, **kwargs):
    """Convenience wrapper taking raw torch-layout weights.

    NOTE: this packs the weights on every call; for real deployments pack once
    with pack_ffn_weights() and call feed_forward_packed() (see __main__).
    """
    H = w1.shape[0]
    if tile_h is None:
        tile_h = _pick_tile_h(H, _tpu_defaults()[1])
    w12, w3_t = pack_ffn_weights(w1, w2, w3, tile_h)
    return feed_forward_packed(x, w12, w3_t, tile_h=tile_h, **kwargs)


def feed_forward_ref(x, w1, w2, w3):
    h1 = jnp.einsum("bse,he->bsh", x, w1)
    h2 = jnp.einsum("bse,he->bsh", x, w2)
    g = (h1 * jax.nn.sigmoid(h1)) * h2
    return jnp.einsum("bsh,eh->bse", g, w3)


if __name__ == "__main__":
    # cfg analog: emb_dim=32, hidden_dim=64, dtype=float32 (small demo shapes)
    B, S, E, H = 2, 8, 32, 64
    key = jax.random.PRNGKey(0)
    kx, k1, k2, k3 = jax.random.split(key, 4)

    x = jax.random.normal(kx, (B, S, E), dtype=jnp.float32)
    # Deterministic params shaped like torch Linear weights (out_features, in_features).
    w1 = jax.random.normal(k1, (H, E), dtype=jnp.float32) * 0.05
    w2 = jax.random.normal(k2, (H, E), dtype=jnp.float32) * 0.05
    w3 = jax.random.normal(k3, (E, H), dtype=jnp.float32) * 0.05

    # One-time weight packing (model-init analog), hoisted out of the forward.
    tile_h = _pick_tile_h(H, _tpu_defaults()[1])
    w12, w3_t = pack_ffn_weights(w1, w2, w3, tile_h)

    fwd = jax.jit(functools.partial(feed_forward_packed, tile_h=tile_h))
    out = jax.block_until_ready(fwd(x, w12, w3_t))

    ref = feed_forward_ref(x, w1, w2, w3)
    assert out.shape == (B, S, E)
    assert jnp.allclose(out, ref, atol=1e-5, rtol=1e-5), "mismatch vs reference"

    print("KERNEL_OK")
</pallas_src>

<mosaic_0001>
module attributes {stable_mosaic.version = 11 : i64} {
  func.func @ffn_kernel(%arg0: i32, %arg1: i32, %arg2: memref<16x32xf32, #tpu.memory_space<vmem>>, %arg3: memref<32x128xf32, #tpu.memory_space<vmem>>, %arg4: memref<64x32xf32, #tpu.memory_space<vmem>>, %arg5: memref<16x32xf32, #tpu.memory_space<vmem>>, %arg6: memref<16x32xf32, #tpu.memory_space<vmem>>) attributes {dimension_semantics = [#tpu.dimension_semantics<parallel>, #tpu.dimension_semantics<arbitrary>], iteration_bounds = array<i64: 1, 1>, scalar_prefetch = 0 : i64, scratch_operands = 1 : i64, tpu.core_type = #tpu.core_type<tc>, window_params = [{transform_indices = @transform_0, window_bounds = array<i64: 16, 32>}, {transform_indices = @transform_1, window_bounds = array<i64: 32, 128>}, {transform_indices = @transform_2, window_bounds = array<i64: 64, 32>}, {transform_indices = @transform_3, window_bounds = array<i64: 16, 32>}]} {
    %c0_i32 = arith.constant 0 : i32
    %0 = arith.cmpi eq, %arg1, %c0_i32 : i32
    %1 = arith.extui %0 : i1 to i32
    %c0_i32_0 = arith.constant 0 : i32
    %2 = arith.cmpi ne, %1, %c0_i32_0 : i32
    scf.if %2 {
      %cst_14 = arith.constant 0.000000e+00 : f32
      %23 = vector.broadcast %cst_14 : f32 to vector<16x32xf32>
      %c0_15 = arith.constant 0 : index
      %c0_16 = arith.constant 0 : index
      %24 = vector.load %arg6[%c0_15, %c0_16] : memref<16x32xf32, #tpu.memory_space<vmem>>, vector<16x32xf32>
      tpu.vector_store %arg6[%c0_15, %c0_16], %23 {strides = array<i32>} : memref<16x32xf32, #tpu.memory_space<vmem>>, vector<16x32xf32>,
    } else {
    }
    %c0 = arith.constant 0 : index
    %c0_1 = arith.constant 0 : index
    %3 = vector.load %arg2[%c0, %c0_1] : memref<16x32xf32, #tpu.memory_space<vmem>>, vector<16x32xf32>
    %c0_2 = arith.constant 0 : index
    %c0_3 = arith.constant 0 : index
    %4 = vector.load %arg3[%c0_2, %c0_3] : memref<32x128xf32, #tpu.memory_space<vmem>>, vector<32x128xf32>
    %cst = arith.constant dense<0.000000e+00> : vector<16x128xf32>
    %5 = tpu.matmul %3, %4, %cst {dimension_numbers = #tpu.dot_dimension_numbers<[1], [0], [0], [1], [0, 0, 1, 1], [], []>} : vector<16x32xf32>, vector<32x128xf32>, vector<16x128xf32> -> vector<16x128xf32>
    %6 = vector.extract_strided_slice %5 {offsets = [0, 0], sizes = [16, 64], strides = [1, 1]} : vector<16x128xf32> to vector<16x64xf32>
    %7 = vector.extract_strided_slice %5 {offsets = [0, 64], sizes = [16, 64], strides = [1, 1]} : vector<16x128xf32> to vector<16x64xf32>
    %8 = arith.negf %6 : vector<16x64xf32>
    %9 = math.exp %8 : vector<16x64xf32>
    %cst_4 = arith.constant 1.000000e+00 : f32
    %10 = vector.broadcast %cst_4 : f32 to vector<16x64xf32>
    %11 = arith.addf %10, %9 : vector<16x64xf32>
    %12 = arith.divf %10, %11 : vector<16x64xf32>
    %13 = arith.mulf %6, %12 : vector<16x64xf32>
    %14 = arith.mulf %13, %7 : vector<16x64xf32>
    %c0_5 = arith.constant 0 : index
    %c0_6 = arith.constant 0 : index
    %15 = vector.load %arg6[%c0_5, %c0_6] : memref<16x32xf32, #tpu.memory_space<vmem>>, vector<16x32xf32>
    %c0_7 = arith.constant 0 : index
    %c0_8 = arith.constant 0 : index
    %16 = vector.load %arg4[%c0_7, %c0_8] : memref<64x32xf32, #tpu.memory_space<vmem>>, vector<64x32xf32>
    %cst_9 = arith.constant dense<0.000000e+00> : vector<16x32xf32>
    %17 = tpu.matmul %14, %16, %cst_9 {dimension_numbers = #tpu.dot_dimension_numbers<[1], [0], [0], [1], [0, 0, 1, 1], [], []>} : vector<16x64xf32>, vector<64x32xf32>, vector<16x32xf32> -> vector<16x32xf32>
    %18 = arith.addf %15, %17 : vector<16x32xf32>
    %c0_10 = arith.constant 0 : index
    %c0_11 = arith.constant 0 : index
    %19 = vector.load %arg6[%c0_10, %c0_11] : memref<16x32xf32, #tpu.memory_space<vmem>>, vector<16x32xf32>
    tpu.vector_store %arg6[%c0_10, %c0_11], %18 {strides = array<i32>} : memref<16x32xf32, #tpu.memory_space<vmem>>, vector<16x32xf32>,
    %c0_i32_12 = arith.constant 0 : i32
    %20 = arith.cmpi eq, %arg1, %c0_i32_12 : i32
    %21 = arith.extui %20 : i1 to i32
    %c0_i32_13 = arith.constant 0 : i32
    %22 = arith.cmpi ne, %21, %c0_i32_13 : i32
    scf.if %22 {
      %c0_14 = arith.constant 0 : index
      %c0_15 = arith.constant 0 : index
      %23 = vector.load %arg6[%c0_14, %c0_15] : memref<16x32xf32, #tpu.memory_space<vmem>>, vector<16x32xf32>
      %c0_16 = arith.constant 0 : index
      %c0_17 = arith.constant 0 : index
      %24 = vector.load %arg5[%c0_16, %c0_17] : memref<16x32xf32, #tpu.memory_space<vmem>>, vector<16x32xf32>
      tpu.vector_store %arg5[%c0_16, %c0_17], %23 {strides = array<i32>} : memref<16x32xf32, #tpu.memory_space<vmem>>, vector<16x32xf32>,
    } else {
    }
    return
  }
  func.func @transform_0(%arg0: i32, %arg1: i32) -> (i32, i32) {
    %c0_i32 = arith.constant 0 : i32
    %c0_i32_0 = arith.constant 0 : i32
    return %arg0, %c0_i32 : i32, i32
  }
  func.func @transform_1(%arg0: i32, %arg1: i32) -> (i32, i32) {
    %c0_i32 = arith.constant 0 : i32
    %c0_i32_0 = arith.constant 0 : i32
    return %c0_i32, %arg1 : i32, i32
  }
  func.func @transform_2(%arg0: i32, %arg1: i32) -> (i32, i32) {
    %c0_i32 = arith.constant 0 : i32
    %c0_i32_0 = arith.constant 0 : i32
    return %arg1, %c0_i32 : i32, i32
  }
  func.func @transform_3(%arg0: i32, %arg1: i32) -> (i32, i32) {
    %c0_i32 = arith.constant 0 : i32
    %c0_i32_0 = arith.constant 0 : i32
    return %arg0, %c0_i32 : i32, i32
  }
}

</mosaic_0001>

<bundles_post_ra>
// kernel: feed_forward_packed.1
= control target key start
LH: loop header
LB: loop body
LE: loop exit
PB: predicated region body
PF: predicated region fallthrough
CT: control target
= control target key end

     0   :  { %vm19_vm0 = vcmask 261120   ;;  %s453_s0 = inlined_call_operand.vmem [shape: f32[16,32], index: 0, kind: input, shape index: {}]   ;;  %s454_s1 = inlined_call_operand.vmem [shape: f32[32,128], index: 1, kind: input, shape index: {}]   ;;  %s455_s2 = inlined_call_operand.vmem [shape: f32[64,32], index: 2, kind: input, shape index: {}]   ;;  %s456_s3 = inlined_call_operand.hbm [shape: f32[16,32], index: 3, kind: output, shape index: {}]  }
   0x1   :  { %v24_v0 = vld [vmem:[%s454_s1] sm:$0xff]  ;;  %v25_v1 = vld [vmem:[%s454_s1 + $0x8] sm:$0xff]  ;;  %v26_v2 = vld [vmem:[%s454_s1 + $0x10] sm:$0xff] }
   0x2   :  { %v305_v3 = vpack.c.bf16 %v25_v1, %v24_v0  ;;  %v27_v4 = vld [vmem:[%s454_s1 + $0x18] sm:$0xff]  ;;  %v22_v5 = vld [vmem:[%s453_s0] sm:$0xff] }
   0x3   :  { %v309_v6 = vpack.c.bf16 %v27_v4, %v26_v2  ;;  %283 = vmatprep.mubr.msk.f32.mxu0 %vm19_vm0, %v22_v5 }
   0x4   :  { %8 = vsyncpa [#allocation4], 0  ;;  %306 = vmatprep.subr.bf16.mxu0 %v305_v3  ;;  %v23_v7 = vld [vmem:[%s453_s0 + $0x8] sm:$0xff]  ;;  %v136_v8 = vld [vmem:[%s455_s2] sm:$0xff]  ;;  %v366_v20 = vmov 0.0   ;;  %s367_s11 = smov 64  }
   0x5   :  { %308 = vmatpush3.bf16.msra.mxu0 %v305_v3  ;;  %v137_v9 = vld [vmem:[%s455_s2 + $0x8] sm:$0xff]  ;;  %v138_v10 = vld [vmem:[%s455_s2 + $0x10] sm:$0xff]  ;;  %v139_v12 = vld [vmem:[%s455_s2 + $0x18] sm:$0xff]  ;;  %21 = vst.msk [vmem:[#allocation2 + $0x8] sm:$0xff] %vm19_vm0, %v366_v20  ;;  %vm144_vm1 = vcmask 523264  }
   0x6   :  { %310 = vmatprep.subr.bf16.mxu0 %v309_v6  ;;  %v313_v11 = vpack.c.bf16 %v137_v9, %v136_v8  ;;  %v317_v13 = vpack.c.bf16 %v139_v12, %v138_v10  ;;  %v140_v14 = vld [vmem:[%s455_s2 + $0x20] sm:$0xff]  ;;  %v141_v15 = vld [vmem:[%s455_s2 + $0x28] sm:$0xff]  ;;  %v142_v17 = vld [vmem:[%s455_s2 + $0x30] sm:$0xff]  ;;  %20 = vst.msk [vmem:[#allocation2] sm:$0xff] %vm19_vm0, %v366_v20 }
   0x7   :  { %v321_v16 = vpack.c.bf16 %v141_v15, %v140_v14  ;;  %v143_v18 = vld [vmem:[%s455_s2 + $0x38] sm:$0xff]  ;;  %s368_s2 = smov [#allocation3]  }
   0x8   :  { %314 = vmatprep.subr.bf16.mxu1 %v313_v11  ;;  %v325_v19 = vpack.c.bf16 %v143_v18, %v142_v17  ;;  %s242_s12 = sshll.u32 %s368_s2, 4  ;;  %s243_s12 = int_to_ptr.vmem [resolvable:$true] %s242_s12 }
   0x9   :  { %312 = vmatpush3.bf16.msra.mxu0 %v309_v6  ;;  %316 = vmatpush3.bf16.msra.mxu1 %v313_v11  ;;  %s342_s13 = scalar_lea.vmem %s243_s12, 256  ;;  %p347_p1 = scmp.lt.s32.totalorder %s243_s12, %s243_s12 }
   0xa   :  { %318 = vmatprep.subr.bf16.mxu1 %v317_v13  ;;  %p343_p0 = scmp.ne.s32.totalorder %s243_s12, %s342_s13  ;;  %p348_p2 = scmp.lt.s32.totalorder %s342_s13, %s342_s13 }
   0xc   :  { %284 = vmatmul.mubr.msk.f32.vlgmr.msra.gmra.mrb[0].mxu0 %vm19_vm0, %v23_v7  ;;  %v135_v37 = vld [vmem:[#allocation2 + $0x8] sm:$0xff]  ;;  %p349_p3 = por %p348_p2, %p347_p1 }
   0xd   :  { %320 = vmatpush3.bf16.msra.mxu1 %v317_v13  ;;  %v134_v38 = vld [vmem:[#allocation2] sm:$0xff] }
   0xe   :  { %322 = vmatprep.subr.bf16.mxu1 %v321_v16  ;;  %p350_p4 = pnand %p349_p3, %p343_p0 }
  0x11   :  { %324 = vmatpush3.bf16.msra.mxu1 %v321_v16 }
  0x12   :  { %326 = vmatprep.subr.bf16.mxu1 %v325_v19 }
  0x15   :  { %328 = vmatpush3.bf16.msra.mxu1 %v325_v19 }
  0xdf   :  { %v285_v21 = vpop.f32.mrb[0].mxu0 }
  0xe0   :  { %v101_v22 = vpop.f32.mrb[1].mxu0  ;;  %v256_v24 = vmul.f32 -1.442695, %v285_v21 }
  0xe1   :  { %126 = vrot.lane.b32.xlu0 %v101_v22, %s367_s11  ;;  %v255_v23 = vmul.f32 -1.442695, %v101_v22 }
  0xe3   :  { %334 = vpow2.f32 %v255_v23 }
  0xe4   :  { %336 = vpow2.f32 %v256_v24 }
  0xe5   :  { %128 = vrot.lane.b32.xlu0 %v285_v21, %s367_s11 }
  0xed   :  { %v335_v25 = vpop.eup %334 }
  0xee   :  { %v116_v26 = vadd.f32 1.0, %v335_v25  ;;  %v337_v27 = vpop.eup %336 }
  0xef   :  { %v117_v28 = vadd.f32 1.0, %v337_v27 }
  0xf0   :  { %338 = vrcp.f32 %v116_v26 }
  0xf1   :  { %340 = vrcp.f32 %v117_v28 }
  0xfa   :  { %v339_v29 = vpop.eup %338 }
  0xfb   :  { %v122_v30 = vmul.f32 %v339_v29, %v101_v22  ;;  %v341_v31 = vpop.eup %340 }
  0xfc   :  { %v123_v34 = vmul.f32 %v341_v31, %v285_v21 }
 0x153   :  { %v127_v32 = vpop.permute.xlu0 %126 }
 0x154   :  { %v132_v33 = vmul.f32 %v127_v32, %v122_v30 }
 0x156   :  { %302 = vmatprep.mubr.msk.f32.mxu1 %vm144_vm1, %v132_v33 }
 0x157   :  { %v129_v35 = vpop.permute.xlu0 %128 }
 0x158   :  { %v133_v36 = vmul.f32 %v129_v35, %v123_v34 }
 0x15a   :  { %303 = vmatmul.mubr.msk.f32.vlgmr.msra.gmra.mrb[0].mxu1 %vm144_vm1, %v133_v36 }
 0x22d   :  { %v304_v39 = vpop.f32.mrb[0].mxu1 }
 0x22e   :  { %v227_v40 = vadd.f32 %v304_v39, %v135_v37  ;;  %v217_v41 = vpop.f32.mrb[1].mxu1 }
 0x22f   :  { %v226_v42 = vadd.f32 %v217_v41, %v134_v38 }
 0x230   :  { %229 = vst.msk [vmem:[#allocation2 + $0x8] sm:$0xff] %vm19_vm0, %v227_v40 }
 0x231   :  { %228 = vst.msk [vmem:[#allocation2] sm:$0xff] %vm19_vm0, %v226_v42 }
 0x237   :  { %v234_v43 = vld [vmem:[#allocation2 + $0x8] sm:$0xff] }
 0x238   :  { %v233_v44 = vld [vmem:[#allocation2] sm:$0xff]  ;;  %236 = vst.msk [vmem:[#allocation3 + $0x8] sm:$0xff] %vm19_vm0, %v234_v43 }
 0x239   :  { %235 = vst.msk [vmem:[#allocation3] sm:$0xff] %vm19_vm0, %v233_v44 }
 0x23a   :  { %353 = shalt.err (!%p350_p4)
}
 0x23b   :  { %s354_s16 = scalar_lea.hbm %s456_s3, 256 }
 0x23c   :  { %p355_p5 = scmp.ne.s32.totalorder %s456_s3, %s354_s16  ;;  %p358_p6 = scmp.lt.u32.totalorder %s354_s16, %s456_s3 }
 0x23e   :  { %p360_p7 = pnand %p358_p6, %p355_p5 }
 0x240   :  { %363 = shalt.err (!%p360_p7)
}
 0x241   :  { %s369_s21 = smov 128   ;;  %s370_s22 = smov 8  }
 0x242   :  { %248 = dma.vmem_to_hbm [thread:$0]  %s243_s12, 256, %s456_s3, [#allocation4], %s369_s21, %s369_s21, %s370_s22  }
 0x243   :  { %364 = dma.done.wait [#allocation4], 256  }
 0x244   :  { %365 = vsyncadd [#allocation4], 4294967040 }
 0x245   :  { %252 = vsyncpa [#allocation4], 1 }

</bundles_post_ra>
